<compile_context>
chip_gen: v6e
topology: v6e:2x2x1
jax: 0.10.0
libtpu: 0.0.40
codegen_flags: <defaults>
</compile_context>

<pallas_src>
import jax
import jax.numpy as jnp
from jax.experimental import pallas as pl
from jax.experimental.pallas import tpu as pltpu

EPS = 1e-5
H1, H2 = 600, 300          # logical hidden sizes (PyTorch module)
H1P, H2P = 640, 384        # lane-padded hidden sizes (multiples of 128)
LANE = 128


def actor_kernel(x_ref, w1_ref, vec_ref, w2_ref, w3_ref, out_ref):
    x = x_ref[...].astype(jnp.bfloat16)                                 # [B, S]

    # Packed BN vectors: row 0=gamma1, 1=beta1, 2=gamma2, 3=beta2 (+bias lane)
    g1 = vec_ref[0:1, :]                                                # [1, H1P]
    be1 = vec_ref[1:2, :]                                               # [1, H1P]
    g2 = vec_ref[2:3, :H2P]                                             # [1, H2P]
    be2 = vec_ref[3:4, :H2P]                                            # [1, H2P]

    # ---- fc1 (bias cancelled by BN) -> BN(train) -> ReLU ------------------
    h1 = jnp.dot(x, w1_ref[...], preferred_element_type=jnp.float32)    # [B, H1P]
    mu1 = jnp.mean(h1, axis=0, keepdims=True)
    var1 = jnp.maximum(jnp.mean(h1 * h1, axis=0, keepdims=True) - mu1 * mu1, 0.0)
    scale1 = g1 * jax.lax.rsqrt(var1 + EPS)
    shift1 = be1 - mu1 * scale1
    h1 = jnp.maximum(h1 * scale1 + shift1, 0.0)                         # fused pass

    # ---- fc2 (bias cancelled by BN) -> BN(train) -> ReLU ------------------
    h2 = jnp.dot(h1.astype(jnp.bfloat16), w2_ref[...],
                 preferred_element_type=jnp.float32)                    # [B, H2P]
    mu2 = jnp.mean(h2, axis=0, keepdims=True)
    var2 = jnp.maximum(jnp.mean(h2 * h2, axis=0, keepdims=True) - mu2 * mu2, 0.0)
    scale2 = g2 * jax.lax.rsqrt(var2 + EPS)
    shift2 = be2 - mu2 * scale2
    h2 = jnp.maximum(h2 * scale2 + shift2, 0.0)
    # Lane H2 of h2 is exactly 1.0 (gamma=0, beta=1 at that padded lane), so
    # row H2 of w3 (which holds b3) supplies the fc3 bias via the matmul.

    # ---- fc3 (+ folded bias) + tanh, lane-dense padded output slab ---------
    h3 = jnp.dot(h2.astype(jnp.bfloat16), w3_ref[...],
                 preferred_element_type=jnp.float32)                    # [B, Apad]
    out_ref[...] = jnp.tanh(h3)


def _pad2d(a, rows, cols):
    return jnp.pad(a, ((0, rows - a.shape[0]), (0, cols - a.shape[1])))


def prepare_kernel_params(p):
    """Pack/pad params for the kernel.

    * w1/w2/w3 zero-padded to lane multiples and cast to bf16.
    * BN vectors packed into one f32 (8, H1P) array (rows 0..3 used).
    * fc3 bias folded into w3 row H2; the matching constant-1 bias lane is
      created by setting beta2[H2]=1 with gamma2[H2]=0 (zero-variance lane:
      scale=0, shift=1 -> h2[:,H2] == 1 after ReLU).
    * fc1/fc2 biases intentionally omitted (cancelled exactly by BN mean).
    Padded hidden features are exactly zero through BN+ReLU, so results match.
    """
    S = p["w1"].shape[0]
    A = p["w3"].shape[1]
    Ap = pl.cdiv(A, LANE) * LANE

    vecs = jnp.zeros((8, H1P), jnp.float32)
    vecs = vecs.at[0, :H1].set(p["g1"][0])
    vecs = vecs.at[1, :H1].set(p["be1"][0])
    vecs = vecs.at[2, :H2].set(p["g2"][0])
    vecs = vecs.at[3, :H2].set(p["be2"][0])
    vecs = vecs.at[3, H2].set(1.0)            # bias lane (gamma stays 0 there)

    w3p = jnp.zeros((H2P, Ap), jnp.float32)
    w3p = w3p.at[:H2, :A].set(p["w3"])
    w3p = w3p.at[H2, :A].set(p["b3"][0])      # folded fc3 bias

    kp = {
        "w1": _pad2d(p["w1"], S, H1P).astype(jnp.bfloat16),
        "vecs": vecs,
        "w2": _pad2d(p["w2"], H1P, H2P).astype(jnp.bfloat16),
        "w3": w3p.astype(jnp.bfloat16),
    }
    return kp, A


def actor_forward(x, kparams, action_size):
    """x: [B, state_size] f32 -> actions [B, action_size] f32."""
    B, S = x.shape
    Ap = kparams["w3"].shape[1]
    vmem = pl.BlockSpec(memory_space=pltpu.MemorySpace.VMEM)
    args = (x, kparams["w1"], kparams["vecs"], kparams["w2"], kparams["w3"])

    flops = 2 * B * (S * H1P + H1P * H2P + H2P * Ap) + 10 * B * (H1P + H2P)
    bytes_accessed = sum(int(a.size) * a.dtype.itemsize for a in args) + B * Ap * 4
    transcendentals = B * Ap + H1P + H2P

    out = pl.pallas_call(
        actor_kernel,
        out_shape=jax.ShapeDtypeStruct((B, Ap), jnp.float32),
        in_specs=[vmem] * len(args),
        out_specs=vmem,
        cost_estimate=pl.CostEstimate(
            flops=flops,
            transcendentals=transcendentals,
            bytes_accessed=bytes_accessed),
    )(*args)
    return out[:, :action_size]


def init_actor_params(key, state_size, action_size):
    """Unpadded f32 params mirroring the PyTorch module's shapes/init ranges.

    fc1: default PyTorch Linear init U(-1/sqrt(in), 1/sqrt(in))
    fc2.weight: U(-0.0015, 0.0015)   fc3.weight: U(-0.003, 0.003)
    BatchNorm: gamma=1, beta=0. Weights stored [in, out] for x @ W.
    b1/b2 exist for reference fidelity but are never sent to the kernel
    (training-mode BN cancels them exactly).
    """
    ks = jax.random.split(key, 6)
    lim1 = 1.0 / jnp.sqrt(jnp.float32(state_size))
    lim2 = 1.0 / jnp.sqrt(jnp.float32(H1))
    lim3 = 1.0 / jnp.sqrt(jnp.float32(H2))
    return {
        "w1": jax.random.uniform(ks[0], (state_size, H1), jnp.float32, -lim1, lim1),
        "b1": jax.random.uniform(ks[1], (1, H1), jnp.float32, -lim1, lim1),
        "w2": jax.random.uniform(ks[2], (H1, H2), jnp.float32, -0.0015, 0.0015),
        "b2": jax.random.uniform(ks[3], (1, H2), jnp.float32, -lim2, lim2),
        "w3": jax.random.uniform(ks[4], (H2, action_size), jnp.float32, -0.003, 0.003),
        "b3": jax.random.uniform(ks[5], (1, action_size), jnp.float32, -lim3, lim3),
        "g1": jnp.ones((1, H1), jnp.float32),
        "be1": jnp.zeros((1, H1), jnp.float32),
        "g2": jnp.ones((1, H2), jnp.float32),
        "be2": jnp.zeros((1, H2), jnp.float32),
    }


def actor_forward_ref(x, p):
    """Pure-JAX f32 reference with the full original semantics (incl. biases)."""
    def bn(h, g, b):
        mu = jnp.mean(h, axis=0, keepdims=True)
        var = jnp.mean((h - mu) ** 2, axis=0, keepdims=True)
        return (h - mu) / jnp.sqrt(var + EPS) * g + b
    h = jax.nn.relu(bn(x @ p["w1"] + p["b1"], p["g1"], p["be1"]))
    h = jax.nn.relu(bn(h @ p["w2"] + p["b2"], p["g2"], p["be2"]))
    return jnp.tanh(h @ p["w3"] + p["b3"])


if __name__ == "__main__":
    state_size, action_size, batch = 24, 4, 8

    key = jax.random.PRNGKey(0)
    k_params, k_x = jax.random.split(key)
    params = init_actor_params(k_params, state_size, action_size)
    x = jax.random.normal(k_x, (batch, state_size), jnp.float32)

    kparams, A = prepare_kernel_params(params)
    out = actor_forward(x, kparams, A)
    out = jax.block_until_ready(out)

    ref = actor_forward_ref(x, params)
    assert out.shape == (batch, action_size)
    err = float(jnp.max(jnp.abs(out - ref)))
    # bf16 matmul path (and bf16-folded b3) vs. f32 reference: relaxed tolerance.
    assert err < 2e-2, f"mismatch vs. JAX reference: {err}"

    print("KERNEL_OK")
</pallas_src>

<mosaic_0001>
module attributes {stable_mosaic.version = 11 : i64} {
  func.func @actor_kernel(%arg0: memref<8x24xf32, #tpu.memory_space<vmem>>, %arg1: memref<24x640xbf16, #tpu.memory_space<vmem>>, %arg2: memref<8x640xf32, #tpu.memory_space<vmem>>, %arg3: memref<640x384xbf16, #tpu.memory_space<vmem>>, %arg4: memref<384x128xbf16, #tpu.memory_space<vmem>>, %arg5: memref<8x128xf32, #tpu.memory_space<vmem>>) attributes {dimension_semantics = [], scalar_prefetch = 0 : i64, scratch_operands = 0 : i64, tpu.core_type = #tpu.core_type<tc>} {
    %c0 = arith.constant 0 : index
    %c0_0 = arith.constant 0 : index
    %0 = vector.load %arg0[%c0, %c0_0] : memref<8x24xf32, #tpu.memory_space<vmem>>, vector<8x24xf32>
    %1 = arith.truncf %0 : vector<8x24xf32> to vector<8x24xbf16>
    %c0_1 = arith.constant 0 : index
    %c0_2 = arith.constant 0 : index
    %2 = vector.load %arg2[%c0_1, %c0_2] : memref<8x640xf32, #tpu.memory_space<vmem>>, vector<1x640xf32>
    %c1 = arith.constant 1 : index
    %c0_3 = arith.constant 0 : index
    %3 = vector.load %arg2[%c1, %c0_3] : memref<8x640xf32, #tpu.memory_space<vmem>>, vector<1x640xf32>
    %c2 = arith.constant 2 : index
    %c0_4 = arith.constant 0 : index
    %4 = vector.load %arg2[%c2, %c0_4] : memref<8x640xf32, #tpu.memory_space<vmem>>, vector<1x384xf32>
    %c3 = arith.constant 3 : index
    %c0_5 = arith.constant 0 : index
    %5 = vector.load %arg2[%c3, %c0_5] : memref<8x640xf32, #tpu.memory_space<vmem>>, vector<1x384xf32>
    %c0_6 = arith.constant 0 : index
    %c0_7 = arith.constant 0 : index
    %6 = vector.load %arg1[%c0_6, %c0_7] : memref<24x640xbf16, #tpu.memory_space<vmem>>, vector<24x640xbf16>
    %cst = arith.constant dense<0.000000e+00> : vector<8x640xf32>
    %7 = tpu.matmul %1, %6, %cst {dimension_numbers = #tpu.dot_dimension_numbers<[1], [0], [0], [1], [0, 0, 1, 1], [], []>} : vector<8x24xbf16>, vector<24x640xbf16>, vector<8x640xf32> -> vector<8x640xf32>
    %cst_8 = arith.constant dense<0.000000e+00> : vector<640xf32>
    %8 = vector.multi_reduction <add>, %7, %cst_8 [0] : vector<8x640xf32> to vector<640xf32>
    %9 = vector.shape_cast %8 : vector<640xf32> to vector<1x640xf32>
    %cst_9 = arith.constant 8.000000e+00 : f32
    %10 = vector.broadcast %cst_9 : f32 to vector<1x640xf32>
    %11 = arith.divf %9, %10 : vector<1x640xf32>
    %12 = arith.mulf %7, %7 : vector<8x640xf32>
    %cst_10 = arith.constant dense<0.000000e+00> : vector<640xf32>
    %13 = vector.multi_reduction <add>, %12, %cst_10 [0] : vector<8x640xf32> to vector<640xf32>
    %14 = vector.shape_cast %13 : vector<640xf32> to vector<1x640xf32>
    %cst_11 = arith.constant 8.000000e+00 : f32
    %15 = vector.broadcast %cst_11 : f32 to vector<1x640xf32>
    %16 = arith.divf %14, %15 : vector<1x640xf32>
    %17 = arith.mulf %11, %11 : vector<1x640xf32>
    %18 = arith.subf %16, %17 : vector<1x640xf32>
    %cst_12 = arith.constant 0.000000e+00 : f32
    %19 = vector.broadcast %cst_12 : f32 to vector<1x640xf32>
    %20 = arith.maximumf %18, %19 : vector<1x640xf32>
    %cst_13 = arith.constant 9.99999974E-6 : f32
    %21 = vector.broadcast %cst_13 : f32 to vector<1x640xf32>
    %22 = arith.addf %20, %21 : vector<1x640xf32>
    %23 = math.rsqrt %22 : vector<1x640xf32>
    %24 = arith.mulf %2, %23 : vector<1x640xf32>
    %25 = arith.mulf %11, %24 : vector<1x640xf32>
    %26 = arith.subf %3, %25 : vector<1x640xf32>
    %27 = vector.broadcast %24 : vector<1x640xf32> to vector<8x640xf32>
    %28 = arith.mulf %7, %27 : vector<8x640xf32>
    %29 = vector.broadcast %26 : vector<1x640xf32> to vector<8x640xf32>
    %30 = arith.addf %28, %29 : vector<8x640xf32>
    %cst_14 = arith.constant 0.000000e+00 : f32
    %31 = vector.broadcast %cst_14 : f32 to vector<8x640xf32>
    %32 = arith.maximumf %30, %31 : vector<8x640xf32>
    %33 = arith.truncf %32 : vector<8x640xf32> to vector<8x640xbf16>
    %c0_15 = arith.constant 0 : index
    %c0_16 = arith.constant 0 : index
    %34 = vector.load %arg3[%c0_15, %c0_16] : memref<640x384xbf16, #tpu.memory_space<vmem>>, vector<640x384xbf16>
    %cst_17 = arith.constant dense<0.000000e+00> : vector<8x384xf32>
    %35 = tpu.matmul %33, %34, %cst_17 {dimension_numbers = #tpu.dot_dimension_numbers<[1], [0], [0], [1], [0, 0, 1, 1], [], []>} : vector<8x640xbf16>, vector<640x384xbf16>, vector<8x384xf32> -> vector<8x384xf32>
    %cst_18 = arith.constant dense<0.000000e+00> : vector<384xf32>
    %36 = vector.multi_reduction <add>, %35, %cst_18 [0] : vector<8x384xf32> to vector<384xf32>
    %37 = vector.shape_cast %36 : vector<384xf32> to vector<1x384xf32>
    %cst_19 = arith.constant 8.000000e+00 : f32
    %38 = vector.broadcast %cst_19 : f32 to vector<1x384xf32>
    %39 = arith.divf %37, %38 : vector<1x384xf32>
    %40 = arith.mulf %35, %35 : vector<8x384xf32>
    %cst_20 = arith.constant dense<0.000000e+00> : vector<384xf32>
    %41 = vector.multi_reduction <add>, %40, %cst_20 [0] : vector<8x384xf32> to vector<384xf32>
    %42 = vector.shape_cast %41 : vector<384xf32> to vector<1x384xf32>
    %cst_21 = arith.constant 8.000000e+00 : f32
    %43 = vector.broadcast %cst_21 : f32 to vector<1x384xf32>
    %44 = arith.divf %42, %43 : vector<1x384xf32>
    %45 = arith.mulf %39, %39 : vector<1x384xf32>
    %46 = arith.subf %44, %45 : vector<1x384xf32>
    %cst_22 = arith.constant 0.000000e+00 : f32
    %47 = vector.broadcast %cst_22 : f32 to vector<1x384xf32>
    %48 = arith.maximumf %46, %47 : vector<1x384xf32>
    %cst_23 = arith.constant 9.99999974E-6 : f32
    %49 = vector.broadcast %cst_23 : f32 to vector<1x384xf32>
    %50 = arith.addf %48, %49 : vector<1x384xf32>
    %51 = math.rsqrt %50 : vector<1x384xf32>
    %52 = arith.mulf %4, %51 : vector<1x384xf32>
    %53 = arith.mulf %39, %52 : vector<1x384xf32>
    %54 = arith.subf %5, %53 : vector<1x384xf32>
    %55 = vector.broadcast %52 : vector<1x384xf32> to vector<8x384xf32>
    %56 = arith.mulf %35, %55 : vector<8x384xf32>
    %57 = vector.broadcast %54 : vector<1x384xf32> to vector<8x384xf32>
    %58 = arith.addf %56, %57 : vector<8x384xf32>
    %cst_24 = arith.constant 0.000000e+00 : f32
    %59 = vector.broadcast %cst_24 : f32 to vector<8x384xf32>
    %60 = arith.maximumf %58, %59 : vector<8x384xf32>
    %61 = arith.truncf %60 : vector<8x384xf32> to vector<8x384xbf16>
    %c0_25 = arith.constant 0 : index
    %c0_26 = arith.constant 0 : index
    %62 = vector.load %arg4[%c0_25, %c0_26] : memref<384x128xbf16, #tpu.memory_space<vmem>>, vector<384x128xbf16>
    %cst_27 = arith.constant dense<0.000000e+00> : vector<8x128xf32>
    %63 = tpu.matmul %61, %62, %cst_27 {dimension_numbers = #tpu.dot_dimension_numbers<[1], [0], [0], [1], [0, 0, 1, 1], [], []>} : vector<8x384xbf16>, vector<384x128xbf16>, vector<8x128xf32> -> vector<8x128xf32>
    %64 = math.tanh %63 : vector<8x128xf32>
    %c0_28 = arith.constant 0 : index
    %c0_29 = arith.constant 0 : index
    %65 = vector.load %arg5[%c0_28, %c0_29] : memref<8x128xf32, #tpu.memory_space<vmem>>, vector<8x128xf32>
    tpu.vector_store %arg5[%c0_28, %c0_29], %64 {strides = array<i32>} : memref<8x128xf32, #tpu.memory_space<vmem>>, vector<8x128xf32>,
    return
  }
}

</mosaic_0001>

<bundles_post_ra>
// kernel: tpu_custom_call.1
= control target key start
LH: loop header
LB: loop body
LE: loop exit
PB: predicated region body
PF: predicated region fallthrough
CT: control target
= control target key end

     0   :  { %10 = vsyncpa [#allocation3], 0  ;;  %s2949_s0 = inlined_call_operand.hbm [shape: f32[8,24], index: 0, kind: input, shape index: {}]   ;;  %s2950_s1 = inlined_call_operand.hbm [shape: bf16[24,640], index: 1, kind: input, shape index: {}]   ;;  %s2951_s2 = inlined_call_operand.hbm [shape: f32[8,640], index: 2, kind: input, shape index: {}]   ;;  %s2952_s3 = inlined_call_operand.hbm [shape: bf16[640,384], index: 3, kind: input, shape index: {}]   ;;  %s2953_s4 = inlined_call_operand.hbm [shape: bf16[384,128], index: 4, kind: input, shape index: {}]   ;;  %s2954_s5 = inlined_call_operand.hbm [shape: f32[8,128], index: 5, kind: output, shape index: {}]  }
   0x1   :  { %11 = vsyncpa [#allocation6], 0 }
   0x2   :  { %12 = vsyncpa [#allocation9], 0 }
   0x3   :  { %13 = vsyncpa [#allocation4], 0  ;;  %s2708_s18 = smov [#allocation5]  }
   0x4   :  { %s29_s19 = sshll.u32 %s2708_s18, 4  ;;  %s30_s19 = int_to_ptr.vmem [resolvable:$true] %s29_s19 }
   0x5   :  { %s2588_s20 = scalar_lea.vmem %s30_s19, 960  ;;  %p2593_p1 = scmp.lt.s32.totalorder %s30_s19, %s30_s19 }
   0x6   :  { %p2589_p0 = scmp.ne.s32.totalorder %s30_s19, %s2588_s20  ;;  %p2594_p2 = scmp.lt.s32.totalorder %s2588_s20, %s2588_s20 }
   0x8   :  { %p2595_p3 = por %p2594_p2, %p2593_p1 }
   0xa   :  { %p2596_p4 = pnand %p2595_p3, %p2589_p0 }
   0xc   :  { %2599 = shalt.err (!%p2596_p4)
}
   0xd   :  { %s2709_s21 = smov 320   ;;  %s2710_s22 = smov 20  }
   0xe   :  { %35 = dma.hbm_to_vmem [thread:$0]  %s2950_s1, 960, %s30_s19, [#allocation6], %s2709_s21, %s2709_s21, %s2710_s22  }
   0xf   :  { %s2711_s25 = smov [#allocation8]  }
  0x10   :  { %s51_s26 = sshll.u32 %s2711_s25, 4  ;;  %s52_s26 = int_to_ptr.vmem [resolvable:$true] %s51_s26 }
  0x11   :  { %s2608_s27 = scalar_lea.vmem %s52_s26, 15360  ;;  %p2613_p6 = scmp.lt.s32.totalorder %s52_s26, %s52_s26 }
  0x12   :  { %p2609_p5 = scmp.ne.s32.totalorder %s52_s26, %s2608_s27  ;;  %p2614_p7 = scmp.lt.s32.totalorder %s2608_s27, %s2608_s27 }
  0x14   :  { %p2615_p8 = por %p2614_p7, %p2613_p6 }
  0x16   :  { %p2616_p9 = pnand %p2615_p8, %p2609_p5 }
  0x18   :  { %2619 = shalt.err (!%p2616_p9)
}
  0x19   :  { %s2712_s28 = smov 192   ;;  %s2713_s29 = smov 12  }
  0x1a   :  { %57 = dma.hbm_to_vmem [thread:$0]  %s2952_s3, 15360, %s52_s26, [#allocation9], %s2712_s28, %s2712_s28, %s2713_s29  }
  0x1b   :  { %s2714_s7 = smov [#allocation2]   ;;  %s2715_s9 = smov [#allocation7]  }
  0x1c   :  { %s20_s8 = sshll.u32 %s2714_s7, 4  ;;  %s42_s1 = sshll.u32 %s2715_s9, 4  ;;  %s21_s8 = int_to_ptr.vmem [resolvable:$true] %s20_s8  ;;  %s43_s1 = int_to_ptr.vmem [resolvable:$true] %s42_s1 }
  0x1d   :  { %s2628_s10 = scalar_lea.vmem %s21_s8, 128  ;;  %p2633_p11 = scmp.lt.s32.totalorder %s21_s8, %s21_s8 }
  0x1e   :  { %p2629_p10 = scmp.ne.s32.totalorder %s21_s8, %s2628_s10  ;;  %p2634_p12 = scmp.lt.s32.totalorder %s2628_s10, %s2628_s10 }
  0x20   :  { %p2635_p13 = por %p2634_p12, %p2633_p11 }
  0x22   :  { %p2636_p0 = pnand %p2635_p13, %p2629_p10 }
  0x24   :  { %2639 = shalt.err (!%p2636_p0)
}
  0x25   :  { %23 = dma.hbm_to_vmem [thread:$0]  %s2949_s0, 128, %s21_s8, [#allocation3]  }
  0x26   :  { %s2648_s13 = scalar_lea.vmem %s43_s1, 640  ;;  %p2653_p2 = scmp.lt.s32.totalorder %s43_s1, %s43_s1 }
  0x27   :  { %p2649_p1 = scmp.ne.s32.totalorder %s43_s1, %s2648_s13  ;;  %p2654_p3 = scmp.lt.s32.totalorder %s2648_s13, %s2648_s13 }
  0x29   :  { %p2655_p4 = por %p2654_p3, %p2653_p2 }
  0x2b   :  { %p2656_p5 = pnand %p2655_p4, %p2649_p1 }
  0x2d   :  { %2659 = shalt.err (!%p2656_p5)
}
  0x2e   :  { %45 = dma.hbm_to_vmem [thread:$0]  %s2951_s2, 640, %s43_s1, [#allocation6]  }
  0x2f   :  { %s2716_s15 = smov [#allocation10]  }
  0x30   :  { %s63_s16 = sshll.u32 %s2716_s15, 4  ;;  %s64_s16 = int_to_ptr.vmem [resolvable:$true] %s63_s16 }
  0x31   :  { %s2668_s17 = scalar_lea.vmem %s64_s16, 3072  ;;  %p2673_p7 = scmp.lt.s32.totalorder %s64_s16, %s64_s16 }
  0x32   :  { %p2669_p6 = scmp.ne.s32.totalorder %s64_s16, %s2668_s17  ;;  %p2674_p8 = scmp.lt.s32.totalorder %s2668_s17, %s2668_s17 }
  0x34   :  { %p2675_p9 = por %p2674_p8, %p2673_p7 }
  0x36   :  { %p2676_p10 = pnand %p2675_p9, %p2669_p6 }
  0x38   :  { %2679 = shalt.err (!%p2676_p10)
}
  0x39   :  { %s2717_s0 = smov 64   ;;  %s2718_s18 = smov 4  }
  0x3a   :  { %69 = dma.hbm_to_vmem [thread:$0]  %s2953_s4, 3072, %s64_s16, [#allocation9], %s2717_s0, %s2717_s0, %s2718_s18  }
  0x3b   :  { %2700 = dma.done.wait [#allocation3], 128  }
  0x3c   :  { %2701 = vsyncadd [#allocation3], 4294967168 }
  0x3d   :  { %2702 = dma.done.wait [#allocation6], 1600  }
  0x3e   :  { %2703 = vsyncadd [#allocation6], 4294965696 }
  0x3f   :  { %2704 = dma.done.wait [#allocation9], 18432  }
  0x40   :  { %2705 = vsyncadd [#allocation9], 4294948864  ;;  %v2719_v0 = vmov 0   ;;  %v105_v1 = vld [vmem:[#allocation5 + $0x28] sm:$0xff]  ;;  %vm151_vm0 = vcmask 1043456   ;;  %v106_v2 = vld [vmem:[#allocation5 + $0x30] sm:$0xff] }
  0x41   :  { %199 = vmatprep.mubr.bf16.mxu0 %v2719_v0  ;;  %240 = vmatprep.mubr.bf16.mxu1 %v2719_v0  ;;  %v2062_v3 = vcombine.high %v105_v1, %v105_v1  ;;  %v2064_v4 = vcombine.high %v106_v2, %v106_v2  ;;  %v2061_v5 = vcombine.low %v105_v1, %v105_v1  ;;  %v2370_v7 = vld [vmem:[#allocation5 + $0x4] ss:$20 sps:$4 sm:$0xff]   ;;  %v2372_v8 = vld [vmem:[#allocation5 + $0xc] ss:$20 sps:$4 sm:$0xff]   ;;  %v2375_v12 = vld [vmem:[#allocation5 + $0x8] ss:$20 sps:$4 sm:$0xff]  }
  0x42   :  { %v2063_v6 = vcombine.low %v106_v2, %v106_v2  ;;  %v2374_v9 = vld [vmem:[#allocation5] ss:$20 sps:$4 sm:$0xff]   ;;  %v86_v13 = vld [vmem:[#allocation2] sm:$0xff]  ;;  %vm147_vm1 = vcmask 195584   ;;  %v2720_v16 = vmov 0.0   ;;  %vm2721_vm2 = vmmov 0  }
  0x43   :  { %2066 = vmatprep.subr.msk.bf16.mxu0 %vm151_vm0, %v2062_v3  ;;  %2068 = vmatprep.subr.msk.bf16.mxu1 %vm151_vm0, %v2064_v4  ;;  %v153_v10 = vsel %vm151_vm0, %v2061_v5, 0  ;;  %v2376_v14 = vld [vmem:[#allocation5 + $0x38] ss:$0 sps:$4 sm:$0xff]   ;;  %v87_v15 = vpack.c.bf16 %v86_v13, %v86_v13  ;;  %v2377_v18 = vld [vmem:[#allocation5 + $0x10] ss:$20 sps:$4 sm:$0xff]   ;;  %s2723_s2 = smov [#allocation11]  }
  0x44   :  { %v159_v11 = vsel %vm151_vm0, %v2063_v6, 0  ;;  %180 = vmatpush1.bf16.msra.mxu0 %v153_v10  ;;  %v165_v17 = vsel %vm151_vm0, %v2376_v14, 0  ;;  %v2380_v19 = vld [vmem:[#allocation8 + $0xac] ss:$12 sps:$4 sm:$0xff]   ;;  %v2378_v21 = vld [vmem:[#allocation8 + $0xa8] ss:$12 sps:$4 sm:$0xff]  }
  0x45   :  { %221 = vmatpush1.bf16.msra.mxu1 %v159_v11  ;;  %181 = vmatprep.subr.bf16.mxu0 %v2370_v7  ;;  %v2383_v20 = vld [vmem:[#allocation8 + $0x22c] ss:$12 sps:$4 sm:$0xff]   ;;  %v2381_v22 = vld [vmem:[#allocation8 + $0x228] ss:$12 sps:$4 sm:$0xff]   ;;  %v2384_v25 = vld [vmem:[#allocation8 + $0x90] ss:$12 sps:$4 sm:$0xff]  }
  0x46   :  { %222 = vmatprep.subr.bf16.mxu1 %v2372_v8  ;;  %v2386_v23 = vld [vmem:[#allocation8 + $0x94] ss:$12 sps:$4 sm:$0xff]   ;;  %v2387_v26 = vld [vmem:[#allocation8 + $0x210] ss:$12 sps:$4 sm:$0xff]   ;;  %v2390_v29 = vld [vmem:[#allocation8 + $0x78] ss:$12 sps:$4 sm:$0xff]  }
  0x47   :  { %v2389_v24 = vld [vmem:[#allocation8 + $0x214] ss:$12 sps:$4 sm:$0xff]   ;;  %v2392_v27 = vld [vmem:[#allocation8 + $0x7c] ss:$12 sps:$4 sm:$0xff]   ;;  %v2393_v30 = vld [vmem:[#allocation8 + $0x1f8] ss:$12 sps:$4 sm:$0xff]  }
  0x48   :  { %182 = vmatpush1.bf16.msra.mxu0 %v2374_v9  ;;  %v2395_v28 = vld [vmem:[#allocation8 + $0x1fc] ss:$12 sps:$4 sm:$0xff]   ;;  %v2398_v31 = vld [vmem:[#allocation8 + $0x64] ss:$12 sps:$4 sm:$0xff]   ;;  %v2396_v33 = vld [vmem:[#allocation8 + $0x60] ss:$12 sps:$4 sm:$0xff]  }
  0x49   :  { %223 = vmatpush1.bf16.msra.mxu1 %v2375_v12  ;;  %2302 = vmatprep.subr.bf16.mxu0 %v2720_v16  ;;  %v2401_v32 = vld [vmem:[#allocation8 + $0x1e4] ss:$12 sps:$4 sm:$0xff]   ;;  %v2399_v34 = vld [vmem:[#allocation8 + $0x1e0] ss:$12 sps:$4 sm:$0xff]   ;;  %v2402_v37 = vld [vmem:[#allocation8 + $0x48] ss:$12 sps:$4 sm:$0xff]  }
  0x4a   :  { %1359 = vmatprep.subr.bf16.mxu1 %v2380_v19  ;;  %v2404_v35 = vld [vmem:[#allocation8 + $0x4c] ss:$12 sps:$4 sm:$0xff]   ;;  %v2405_v38 = vld [vmem:[#allocation8 + $0x1c8] ss:$12 sps:$4 sm:$0xff]   ;;  %v2408_v41 = vld [vmem:[#allocation8 + $0x30] ss:$12 sps:$4 sm:$0xff]  }
  0x4b   :  { %2067 = vmatmul.mubr.msk.bf16.vlgmr.msra.gmra.mxu0 %vm147_vm1, %v87_v15  ;;  %v2407_v36 = vld [vmem:[#allocation8 + $0x1cc] ss:$12 sps:$4 sm:$0xff]   ;;  %v2410_v39 = vld [vmem:[#allocation8 + $0x34] ss:$12 sps:$4 sm:$0xff]   ;;  %v2411_v42 = vld [vmem:[#allocation8 + $0x1b0] ss:$12 sps:$4 sm:$0xff]  }
  0x4c   :  { %2069 = vmatmul.mubr.msk.bf16.vlgmr.msra.gmra.mxu1 %vm147_vm1, %v87_v15  ;;  %2303 = vmatpush3.bf16.msra.mxu0 %v165_v17  ;;  %v2413_v40 = vld [vmem:[#allocation8 + $0x1b4] ss:$12 sps:$4 sm:$0xff]   ;;  %v2416_v43 = vld [vmem:[#allocation8 + $0x1c] ss:$12 sps:$4 sm:$0xff]   ;;  %v2414_v45 = vld [vmem:[#allocation8 + $0x18] ss:$12 sps:$4 sm:$0xff]  }
  0x4d   :  { %2306 = vmatprep.mubr.msk.bf16.mxu0 %vm2721_vm2, %v2720_v16  ;;  %2304 = vmatprep.subr.bf16.mxu0 %v2720_v16  ;;  %v2419_v44 = vld [vmem:[#allocation8 + $0x19c] ss:$12 sps:$4 sm:$0xff]   ;;  %v2417_v46 = vld [vmem:[#allocation8 + $0x198] ss:$12 sps:$4 sm:$0xff]   ;;  %v2420_v49 = vld [vmem:[#allocation8] ss:$12 sps:$4 sm:$0xff]  }
  0x4e   :  { %1360 = vmatpush1.bf16.msra.mxu1 %v2378_v21  ;;  %v2422_v47 = vld [vmem:[#allocation8 + $0x4] ss:$12 sps:$4 sm:$0xff]   ;;  %v2423_v50 = vld [vmem:[#allocation8 + $0x180] ss:$12 sps:$4 sm:$0xff]   ;;  %v2426_v53 = vld [vmem:[#allocation8 + $0x168] ss:$12 sps:$4 sm:$0xff]  }
  0x4f   :  { %1361 = vmatprep.subr.bf16.mxu1 %v2386_v23  ;;  %v2425_v48 = vld [vmem:[#allocation8 + $0x184] ss:$12 sps:$4 sm:$0xff]   ;;  %v2428_v51 = vld [vmem:[#allocation8 + $0x16c] ss:$12 sps:$4 sm:$0xff]   ;;  %v2429_v54 = vld [vmem:[#allocation8 + $0x2e8] ss:$12 sps:$4 sm:$0xff]  }
  0x50   :  { %2305 = vmatpush3.bf16.msra.mxu0 %v2377_v18  ;;  %v2431_v52 = vld [vmem:[#allocation8 + $0x2ec] ss:$12 sps:$4 sm:$0xff]   ;;  %v2434_v55 = vld [vmem:[#allocation8 + $0x154] ss:$12 sps:$4 sm:$0xff]   ;;  %v2432_v57 = vld [vmem:[#allocation8 + $0x150] ss:$12 sps:$4 sm:$0xff]  }
  0x51   :  { %1400 = vmatprep.subr.bf16.mxu0 %v2383_v20  ;;  %v2437_v56 = vld [vmem:[#allocation8 + $0x2d4] ss:$12 sps:$4 sm:$0xff]   ;;  %v2435_v58 = vld [vmem:[#allocation8 + $0x2d0] ss:$12 sps:$4 sm:$0xff]   ;;  %v2438_v61 = vld [vmem:[#allocation8 + $0x138] ss:$12 sps:$4 sm:$0xff]  }
  0x52   :  { %1362 = vmatpush1.bf16.msra.mxu1 %v2384_v25  ;;  %v2440_v59 = vld [vmem:[#allocation8 + $0x13c] ss:$12 sps:$4 sm:$0xff]   ;;  %v2441_v62 = vld [vmem:[#allocation8 + $0x2b8] ss:$12 sps:$4 sm:$0xff]   ;;  %v2444_v2 = vld [vmem:[#allocation8 + $0x120] ss:$12 sps:$4 sm:$0xff]  }
  0x53   :  { %2307 = vmatmul.mubr.msk.bf16.vlgmr.msra.gmra.mxu0 %vm147_vm1, %v87_v15  ;;  %1363 = vmatprep.subr.bf16.mxu1 %v2392_v27  ;;  %v2443_v60 = vld [vmem:[#allocation8 + $0x2bc] ss:$12 sps:$4 sm:$0xff]   ;;  %v2446_v63 = vld [vmem:[#allocation8 + $0x124] ss:$12 sps:$4 sm:$0xff]   ;;  %v2447_v3 = vld [vmem:[#allocation8 + $0x2a0] ss:$12 sps:$4 sm:$0xff]  }
  0x54   :  { %1401 = vmatpush1.bf16.msra.mxu0 %v2381_v22  ;;  %v2449_v1 = vld [vmem:[#allocation8 + $0x2a4] ss:$12 sps:$4 sm:$0xff]   ;;  %v2452_v4 = vld [vmem:[#allocation8 + $0x10c] ss:$12 sps:$4 sm:$0xff]   ;;  %v2450_v6 = vld [vmem:[#allocation8 + $0x108] ss:$12 sps:$4 sm:$0xff]  }
  0x55   :  { %1402 = vmatprep.subr.bf16.mxu0 %v2389_v24  ;;  %v2455_v5 = vld [vmem:[#allocation8 + $0x28c] ss:$12 sps:$4 sm:$0xff]   ;;  %v2453_v7 = vld [vmem:[#allocation8 + $0x288] ss:$12 sps:$4 sm:$0xff]   ;;  %v2456_v10 = vld [vmem:[#allocation8 + $0xf0] ss:$12 sps:$4 sm:$0xff]  }
  0x56   :  { %1364 = vmatpush1.bf16.msra.mxu1 %v2390_v29  ;;  %v2458_v8 = vld [vmem:[#allocation8 + $0xf4] ss:$12 sps:$4 sm:$0xff]   ;;  %v2459_v11 = vld [vmem:[#allocation8 + $0x270] ss:$12 sps:$4 sm:$0xff]   ;;  %v2462_v14 = vld [vmem:[#allocation8 + $0xd8] ss:$12 sps:$4 sm:$0xff]  }
  0x57   :  { %1365 = vmatprep.subr.bf16.mxu1 %v2398_v31  ;;  %v2461_v9 = vld [vmem:[#allocation8 + $0x274] ss:$12 sps:$4 sm:$0xff]   ;;  %v2464_v12 = vld [vmem:[#allocation8 + $0xdc] ss:$12 sps:$4 sm:$0xff]   ;;  %v2465_v15 = vld [vmem:[#allocation8 + $0x258] ss:$12 sps:$4 sm:$0xff]  }
  0x58   :  { %1403 = vmatpush1.bf16.msra.mxu0 %v2387_v26  ;;  %v2467_v13 = vld [vmem:[#allocation8 + $0x25c] ss:$12 sps:$4 sm:$0xff]   ;;  %v2470_v17 = vld [vmem:[#allocation8 + $0xc4] ss:$12 sps:$4 sm:$0xff]   ;;  %v2468_v19 = vld [vmem:[#allocation8 + $0xc0] ss:$12 sps:$4 sm:$0xff]  }
  0x59   :  { %1404 = vmatprep.subr.bf16.mxu0 %v2395_v28  ;;  %v2473_v18 = vld [vmem:[#allocation8 + $0x244] ss:$12 sps:$4 sm:$0xff]   ;;  %v2471_v20 = vld [vmem:[#allocation8 + $0x240] ss:$12 sps:$4 sm:$0xff]   ;;  %s2045_s4 = sshll.u32 %s2723_s2, 4  ;;  %s2046_s4 = int_to_ptr.vmem [resolvable:$true] %s2045_s4 }
  0x5a   :  { %1366 = vmatpush1.bf16.msra.mxu1 %v2396_v33  ;;  %v2476_v21 = vld [vmem:[#allocation8 + $0x3ac] ss:$12 sps:$4 sm:$0xff]   ;;  %v2477_v22 = vld [vmem:[#allocation8 + $0x170] ss:$12 sps:$4 sm:$0xff]   ;;  %s2680_s21 = scalar_lea.vmem %s2046_s4, 128  ;;  %p2685_p12 = scmp.lt.s32.totalorder %s2046_s4, %s2046_s4 }
  0x5b   :  { %1367 = vmatprep.subr.bf16.mxu1 %v2404_v35  ;;  %p2681_p11 = scmp.ne.s32.totalorder %s2046_s4, %s2680_s21  ;;  %p2686_p13 = scmp.lt.s32.totalorder %s2680_s21, %s2680_s21 }
  0x5c   :  { %1405 = vmatpush1.bf16.msra.mxu0 %v2393_v30 }
  0x5d   :  { %1406 = vmatprep.subr.bf16.mxu0 %v2401_v32  ;;  %p2687_p0 = por %p2686_p13, %p2685_p12 }
  0x5e   :  { %1368 = vmatpush1.bf16.msra.mxu1 %v2402_v37 }
  0x5f   :  { %1369 = vmatprep.subr.bf16.mxu1 %v2410_v39  ;;  %p2688_p1 = pnand %p2687_p0, %p2681_p11 }
  0x60   :  { %1407 = vmatpush1.bf16.msra.mxu0 %v2399_v34 }
  0x61   :  { %1408 = vmatprep.subr.bf16.mxu0 %v2407_v36 }
  0x62   :  { %1370 = vmatpush1.bf16.msra.mxu1 %v2408_v41 }
  0x63   :  { %1371 = vmatprep.subr.bf16.mxu1 %v2416_v43 }
  0x64   :  { %1409 = vmatpush1.bf16.msra.mxu0 %v2405_v38 }
  0x65   :  { %1410 = vmatprep.subr.bf16.mxu0 %v2413_v40 }
  0x66   :  { %1372 = vmatpush1.bf16.msra.mxu1 %v2414_v45 }
  0x67   :  { %1373 = vmatprep.subr.bf16.mxu1 %v2422_v47 }
  0x68   :  { %1411 = vmatpush1.bf16.msra.mxu0 %v2411_v42 }
  0x69   :  { %1412 = vmatprep.subr.bf16.mxu0 %v2419_v44 }
  0x6a   :  { %1374 = vmatpush1.bf16.msra.mxu1 %v2420_v49 }
  0x6b   :  { %1375 = vmatprep.subr.bf16.mxu1 %v2428_v51 }
  0x6c   :  { %1413 = vmatpush1.bf16.msra.mxu0 %v2417_v46 }
  0x6d   :  { %1414 = vmatprep.subr.bf16.mxu0 %v2425_v48 }
  0x6e   :  { %1376 = vmatpush2.bf16.msra.mxu1 %v2426_v53 }
  0x6f   :  { %1377 = vmatprep.subr.bf16.mxu1 %v2434_v55 }
  0x70   :  { %1415 = vmatpush1.bf16.msra.mxu0 %v2423_v50 }
  0x71   :  { %1416 = vmatprep.subr.bf16.mxu0 %v2431_v52 }
  0x72   :  { %1378 = vmatpush2.bf16.msra.mxu1 %v2432_v57 }
  0x73   :  { %1379 = vmatprep.subr.bf16.mxu1 %v2440_v59 }
  0x74   :  { %1417 = vmatpush2.bf16.msra.mxu0 %v2429_v54 }
  0x75   :  { %1418 = vmatprep.subr.bf16.mxu0 %v2437_v56 }
  0x76   :  { %1380 = vmatpush2.bf16.msra.mxu1 %v2438_v61 }
  0x77   :  { %1381 = vmatprep.subr.bf16.mxu1 %v2446_v63 }
  0x78   :  { %1419 = vmatpush2.bf16.msra.mxu0 %v2435_v58 }
  0x79   :  { %1420 = vmatprep.subr.bf16.mxu0 %v2443_v60 }
  0x7a   :  { %1382 = vmatpush2.bf16.msra.mxu1 %v2444_v2 }
  0x7b   :  { %1383 = vmatprep.subr.bf16.mxu1 %v2452_v4 }
  0x7c   :  { %1421 = vmatpush2.bf16.msra.mxu0 %v2441_v62 }
  0x7d   :  { %1422 = vmatprep.subr.bf16.mxu0 %v2449_v1 }
  0x7e   :  { %1384 = vmatpush2.bf16.msra.mxu1 %v2450_v6 }
  0x7f   :  { %1385 = vmatprep.subr.bf16.mxu1 %v2458_v8 }
  0x80   :  { %1423 = vmatpush2.bf16.msra.mxu0 %v2447_v3 }
  0x81   :  { %1424 = vmatprep.subr.bf16.mxu0 %v2455_v5 }
  0x82   :  { %1386 = vmatpush2.bf16.msra.mxu1 %v2456_v10 }
  0x83   :  { %1387 = vmatprep.subr.bf16.mxu1 %v2464_v12 }
  0x84   :  { %1425 = vmatpush2.bf16.msra.mxu0 %v2453_v7 }
  0x85   :  { %1426 = vmatprep.subr.bf16.mxu0 %v2461_v9 }
  0x86   :  { %1388 = vmatpush2.bf16.msra.mxu1 %v2462_v14 }
  0x87   :  { %1389 = vmatprep.subr.bf16.mxu1 %v2470_v17 }
  0x88   :  { %1427 = vmatpush2.bf16.msra.mxu0 %v2459_v11 }
  0x89   :  { %1428 = vmatprep.subr.bf16.mxu0 %v2467_v13 }
  0x8a   :  { %1390 = vmatpush2.bf16.msra.mxu1 %v2468_v19 }
  0x8b   :  { %1441 = vmatprep.subr.bf16.mxu1 %v2476_v21 }
  0x8c   :  { %1429 = vmatpush2.bf16.msra.mxu0 %v2465_v15 }
  0x8d   :  { %1430 = vmatprep.subr.bf16.mxu0 %v2473_v18 }
  0x90   :  { %1431 = vmatpush2.bf16.msra.mxu0 %v2471_v20 }
  0x91   :  { %2218 = vmatprep.subr.bf16.mxu0 %v2477_v22 }
 0x10b   :  { %v2780_v23 = vpop.f32.mrf.mxu0 }
 0x10c   :  { %v2782_v24 = vpop.f32.mrf.mxu1  ;;  %v289_v25 = vrot.slane %v2780_v23, 4  ;;  %v325_v26 = vmul.f32 %v2780_v23, %v2780_v23 }
 0x10d   :  { %v301_v27 = vrot.slane %v2782_v24, 4  ;;  %v327_v28 = vmul.f32 %v2782_v24, %v2782_v24  ;;  %v2790_v29 = vpop.f32.mrf.mxu0 }
 0x10e   :  { %v2792_v30 = vpop.f32.mrf.mxu1  ;;  %v290_v31 = vadd.f32 %v289_v25, %v2780_v23  ;;  %v330_v32 = vrot.slane %v325_v26, 4  ;;  %v295_v35 = vrot.slane %v2790_v29, 4  ;;  %v326_v36 = vmul.f32 %v2790_v29, %v2790_v29 }
 0x10f   :  { %v302_v33 = vadd.f32 %v301_v27, %v2782_v24  ;;  %v342_v34 = vrot.slane %v327_v28, 4  ;;  %v307_v37 = vrot.slane %v2792_v30, 4  ;;  %v328_v38 = vmul.f32 %v2792_v30, %v2792_v30  ;;  %v205_v39 = vpop.f32.mrf.mxu0 }
 0x110   :  { %v246_v40 = vpop.f32.mrf.mxu1  ;;  %v291_v41 = vrot.slane %v290_v31, 2  ;;  %v331_v42 = vadd.f32 %v330_v32, %v325_v26  ;;  %v296_v45 = vadd.f32 %v295_v35, %v2790_v29  ;;  %v336_v46 = vrot.slane %v326_v36, 4 }
 0x111   :  { %v303_v43 = vrot.slane %v302_v33, 2  ;;  %v343_v44 = vadd.f32 %v342_v34, %v327_v28  ;;  %v308_v47 = vadd.f32 %v307_v37, %v2792_v30  ;;  %v348_v48 = vrot.slane %v328_v38, 4  ;;  %v206_v49 = vpop.f32.mrf.mxu0 }
 0x112   :  { %v247_v50 = vpop.f32.mrf.mxu1  ;;  %v292_v51 = vadd.f32 %v291_v41, %v290_v31  ;;  %v332_v52 = vrot.slane %v331_v42, 2  ;;  %v297_v55 = vrot.slane %v296_v45, 2  ;;  %v337_v56 = vadd.f32 %v336_v46, %v326_v36 }
 0x113   :  { %v304_v53 = vadd.f32 %v303_v43, %v302_v33  ;;  %v344_v54 = vrot.slane %v343_v44, 2  ;;  %v309_v57 = vrot.slane %v308_v47, 2  ;;  %v349_v58 = vadd.f32 %v348_v48, %v328_v38  ;;  %v2804_v59 = vpop.f32.mrf.mxu0 }
 0x114   :  { %v293_v60 = vrot.slane %v292_v51, 1  ;;  %v333_v61 = vadd.f32 %v332_v52, %v331_v42  ;;  %v298_v1 = vadd.f32 %v297_v55, %v296_v45  ;;  %v338_v2 = vrot.slane %v337_v56, 2 }
 0x115   :  { %v305_v62 = vrot.slane %v304_v53, 1  ;;  %v345_v63 = vadd.f32 %v344_v54, %v343_v44  ;;  %v310_v3 = vadd.f32 %v309_v57, %v308_v47  ;;  %v350_v4 = vrot.slane %v349_v58, 2  ;;  %v2308_v5 = vpop.f32.mrf.mxu0 }
 0x116   :  { %v294_v6 = vadd.f32 %v293_v60, %v292_v51  ;;  %v334_v7 = vrot.slane %v333_v61, 1  ;;  %v299_v10 = vrot.slane %v298_v1, 1  ;;  %v339_v11 = vadd.f32 %v338_v2, %v337_v56 }
 0x117   :  { %v306_v8 = vadd.f32 %v305_v62, %v304_v53  ;;  %v346_v9 = vrot.slane %v345_v63, 1  ;;  %v311_v12 = vrot.slane %v310_v3, 1  ;;  %v351_v13 = vadd.f32 %v350_v4, %v349_v58  ;;  %v286_v14 = vpop.f32.mrf.mxu0 }
 0x118   :  { %v2806_v15 = vmul.f32 0.125, %v294_v6  ;;  %v335_v17 = vadd.f32 %v334_v7, %v333_v61  ;;  %v300_v20 = vadd.f32 %v299_v10, %v298_v1  ;;  %v340_v21 = vrot.slane %v339_v11, 1 }
 0x119   :  { %v2808_v18 = vmul.f32 0.125, %v306_v8  ;;  %v347_v19 = vadd.f32 %v346_v9, %v345_v63  ;;  %v312_v22 = vadd.f32 %v311_v12, %v310_v3  ;;  %v352_v25 = vrot.slane %v351_v13, 1  ;;  %v2309_v26 = vpop.f32.mrf.mxu0 }
 0x11a   :  { %v360_v27 = vmul.f32 0.125, %v335_v17  ;;  %v365_v28 = vmul.f32 %v2806_v15, %v2806_v15  ;;  %v2814_v33 = vmul.f32 0.125, %v300_v20  ;;  %v341_v34 = vadd.f32 %v340_v21, %v339_v11 }
 0x11b   :  { %v362_v31 = vmul.f32 0.125, %v347_v19  ;;  %v367_v32 = vmul.f32 %v2808_v18, %v2808_v18  ;;  %v2816_v35 = vmul.f32 0.125, %v312_v22  ;;  %v353_v36 = vadd.f32 %v352_v25, %v351_v13 }
 0x11c   :  { %v370_v37 = vsub.f32 %v360_v27, %v365_v28  ;;  %v313_v39 = vrot.slane %v2804_v59, 4  ;;  %v329_v40 = vmul.f32 %v2804_v59, %v2804_v59  ;;  %v361_v41 = vmul.f32 0.125, %v341_v34  ;;  %v88_v34 = vld [vmem:[#allocation7] ss:$8 sm:$0xf] }
 0x11d   :  { %v372_v38 = vsub.f32 %v362_v31, %v367_v32  ;;  %v366_v42 = vmul.f32 %v2814_v33, %v2814_v33  ;;  %v363_v43 = vmul.f32 0.125, %v353_v36  ;;  %v368_v44 = vmul.f32 %v2816_v35, %v2816_v35  ;;  %v89_v36 = vld [vmem:[#allocation7] ss:$8 sm:$0x10] }
 0x11e   :  { %v314_v45 = vadd.f32 %v313_v39, %v2804_v59  ;;  %v354_v46 = vrot.slane %v329_v40, 4  ;;  %v375_v47 = vmax.f32 %v370_v37, 0.0  ;;  %v2722_v9 = vmov 1966171168  }
 0x11f   :  { %v371_v48 = vsub.f32 %v361_v41, %v366_v42  ;;  %v373_v49 = vsub.f32 %v363_v43, %v368_v44  ;;  %v377_v50 = vmax.f32 %v372_v38, 0.0  ;;  %v398_v10 = vunpack.c.l.s4 %v2722_v9 }
 0x120   :  { %v315_v51 = vrot.slane %v314_v45, 2  ;;  %v355_v52 = vadd.f32 %v354_v46, %v329_v40  ;;  %v380_v57 = vadd.f32 1e-05, %v375_v47  ;;  %v400_v11 = vlaneseq }
 0x121   :  { %v376_v53 = vmax.f32 %v371_v48, 0.0  ;;  %v378_v54 = vmax.f32 %v373_v49, 0.0  ;;  %v382_v61 = vadd.f32 1e-05, %v377_v50  ;;  %v399_v14 = vunpack.c.0.s8 %v398_v10 }
 0x122   :  { %v316_v55 = vadd.f32 %v315_v51, %v314_v45  ;;  %v356_v56 = vrot.slane %v355_v52, 2  ;;  %v2826_v17 = vshrl.u32 %v400_v11, 7  ;;  %v90_v38 = vor.u32 %v89_v36, %v88_v34  ;;  %v2482_v34 = vld [vmem:[#allocation8 + $0x158] ss:$12 sps:$4 sm:$0xff]   ;;  %v2479_v36 = vld [vmem:[#allocation8 + $0x390] ss:$12 sps:$4 sm:$0xff]  }
 0x123   :  { %v381_v58 = vadd.f32 1e-05, %v376_v53  ;;  %v383_v60 = vadd.f32 1e-05, %v378_v54 }
 0x124   :  { %v317_v62 = vrot.slane %v316_v55, 1  ;;  %v357_v63 = vadd.f32 %v356_v56, %v355_v52  ;;  %v2829_v26 = vsub.s32 %v399_v14, %v2826_v17  ;;  %v2837_v41 = vsub.s32 0, %v2826_v17 }
 0x125   :  { %2562 = vrsqrt.f32 %v381_v58  ;;  %v2840_v43 = vsub.s32 1, %v2826_v17  ;;  %v2843_v44 = vsub.s32 2, %v2826_v17  ;;  %v451_v45 = vsub.s32 3, %v2826_v17 }
 0x126   :  { %2564 = vrsqrt.f32 %v383_v60  ;;  %v318_v1 = vadd.f32 %v317_v62, %v316_v55  ;;  %v358_v2 = vrot.slane %v357_v63, 1  ;;  %v455_v46 = vsub.s32 4, %v2826_v17  ;;  %v2509_v17 = vld [vmem:[#allocation8 + $0x300] ss:$12 sps:$4 sm:$0xff]  }
 0x127   :  { %2566 = vrsqrt.f32 %v380_v57 }
 0x128   :  { %2568 = vrsqrt.f32 %v382_v61  ;;  %v324_v3 = vmul.f32 0.125, %v318_v1  ;;  %v359_v4 = vadd.f32 %v358_v2, %v357_v63  ;;  %v92_v1 = vld [vmem:[#allocation7 + $0x1] ss:$8 sm:$0xf] }
 0x129   :  { %v93_v2 = vld [vmem:[#allocation7 + $0x1] ss:$8 sm:$0x10] }
 0x12a   :  { %v364_v5 = vmul.f32 0.125, %v359_v4  ;;  %v369_v6 = vmul.f32 %v324_v3, %v324_v3 }
 0x12c   :  { %v374_v7 = vsub.f32 %v364_v5, %v369_v6 }
 0x12e   :  { %v379_v8 = vmax.f32 %v374_v7, 0.0 }
 0x130   :  { %v384_v12 = vadd.f32 1e-05, %v379_v8 }
 0x132   :  { %v2563_v13 = vpop.eup %2562  ;;  %2570 = vrsqrt.f32 %v384_v12 }
 0x133   :  { %v2565_v19 = vpop.eup %2564 }
 0x134   :  { %v2567_v20 = vpop.eup %2566 }
 0x135   :  { %v2569_v21 = vpop.eup %2568  ;;  %v395_v22 = vcombine.low %v2567_v20, %v2563_v13 }
 0x136   :  { %v396_v25 = vcombine.low %v2569_v21, %v2565_v19 }
 0x137   :  { %v403_v27 = vrot.slane %v395_v22, %v2829_v26 }
 0x138   :  { %v410_v28 = vrot.slane %v396_v25, %v2829_v26 }
 0x13a   :  { %v418_v31 = vcombine.low %v403_v27, %v410_v28 }
 0x13c   :  { %v425_v39 = vrot.slane %v418_v31, %v2829_v26  ;;  %v2478_v31 = vld [vmem:[#allocation8 + $0xb0] ss:$12 sps:$4 sm:$0xff]  }
 0x13f   :  { %v2571_v32 = vpop.eup %2570 }
 0x140   :  { %v417_v37 = vrot.slane %v2571_v32, %v2829_v26 }
 0x142   :  { %v432_v40 = vrot.slane %v417_v37, %v2829_v26  ;;  %v2483_v37 = vld [vmem:[#allocation8 + $0x98] ss:$12 sps:$4 sm:$0xff]  }
 0x144   :  { %v433_v42 = vcombine.low %v425_v39, %v432_v40  ;;  %v2487_v39 = vld [vmem:[#allocation8 + $0x140] ss:$12 sps:$4 sm:$0xff]   ;;  %v2484_v40 = vld [vmem:[#allocation8 + $0x378] ss:$12 sps:$4 sm:$0xff]  }
 0x146   :  { %v435_v47 = vmul.f32 %v433_v42, %v90_v38  ;;  %v2486_v38 = vld [vmem:[#allocation8 + $0x37c] ss:$12 sps:$4 sm:$0xff]   ;;  %v2488_v42 = vld [vmem:[#allocation8 + $0x80] ss:$12 sps:$4 sm:$0xff]  }
 0x148   :  { %v440_v48 = vrot.slane %v435_v47, %v2837_v41  ;;  %v444_v49 = vrot.slane %v435_v47, %v2840_v43  ;;  %v448_v50 = vrot.slane %v435_v47, %v2843_v44  ;;  %v452_v51 = vrot.slane %v435_v47, %v451_v45 }
 0x149   :  { %v2852_v52 = vrot.slane %v435_v47, %v455_v46  ;;  %v2492_v47 = vld [vmem:[#allocation8 + $0x128] ss:$12 sps:$4 sm:$0xff]  }
 0x14a   :  { %v462_v53 = vmul.f32 %v440_v48, %v2806_v15  ;;  %v463_v54 = vmul.f32 %v444_v49, %v2814_v33  ;;  %v464_v55 = vmul.f32 %v448_v50, %v2808_v18  ;;  %v465_v56 = vmul.f32 %v452_v51, %v2816_v35 }
 0x14b   :  { %v466_v57 = vmul.f32 %v2852_v52, %v324_v3  ;;  %v94_v15 = vor.u32 %v93_v2, %v92_v1  ;;  %v514_v3 = vmul.f32 %v444_v49, %v2790_v29  ;;  %v516_v6 = vmul.f32 %v452_v51, %v2792_v30  ;;  %v2493_v49 = vld [vmem:[#allocation8 + $0x68] ss:$12 sps:$4 sm:$0xff]   ;;  %v2497_v51 = vld [vmem:[#allocation8 + $0x110] ss:$12 sps:$4 sm:$0xff]   ;;  %v2508_v1 = vld [vmem:[#allocation8 + $0x20] ss:$12 sps:$4 sm:$0xff]  }
 0x14c   :  { %v472_v58 = vcombine.low %v462_v53, %v463_v54  ;;  %v473_v60 = vcombine.low %v464_v55, %v465_v56  ;;  %v513_v9 = vmul.f32 %v440_v48, %v2780_v23  ;;  %v515_v11 = vmul.f32 %v448_v50, %v2782_v24  ;;  %v2474_v23 = vld [vmem:[#allocation8 + $0x3a8] ss:$12 sps:$4 sm:$0xff]   ;;  %v2489_v48 = vld [vmem:[#allocation8 + $0x360] ss:$12 sps:$4 sm:$0xff]   ;;  %v2502_v55 = vld [vmem:[#allocation8 + $0xf8] ss:$12 sps:$4 sm:$0xff]  }
 0x14d   :  { %v494_v63 = vrot.slane %v466_v57, %v2829_v26  ;;  %v2481_v24 = vld [vmem:[#allocation8 + $0x394] ss:$12 sps:$4 sm:$0xff]   ;;  %v2496_v50 = vld [vmem:[#allocation8 + $0x34c] ss:$12 sps:$4 sm:$0xff]   ;;  %v2499_v56 = vld [vmem:[#allocation8 + $0x330] ss:$12 sps:$4 sm:$0xff]  }
 0x14e   :  { %v480_v61 = vrot.slane %v472_v58, %v2829_v26  ;;  %v487_v62 = vrot.slane %v473_v60, %v2829_v26  ;;  %v2494_v53 = vld [vmem:[#allocation8 + $0x348] ss:$12 sps:$4 sm:$0xff]   ;;  %v2503_v57 = vld [vmem:[#allocation8 + $0x38] ss:$12 sps:$4 sm:$0xff]  }
 0x14f   :  { %v509_v18 = vrot.slane %v494_v63, %v2829_v26  ;;  %v2501_v54 = vld [vmem:[#allocation8 + $0x334] ss:$12 sps:$4 sm:$0xff]   ;;  %v2506_v60 = vld [vmem:[#allocation8 + $0x31c] ss:$12 sps:$4 sm:$0xff]   ;;  %v2504_v63 = vld [vmem:[#allocation8 + $0x318] ss:$12 sps:$4 sm:$0xff]  }
 0x150   :  { %v495_v4 = vcombine.low %v480_v61, %v487_v62  ;;  %v2507_v61 = vld [vmem:[#allocation8 + $0xe0] ss:$12 sps:$4 sm:$0xff]   ;;  %v517_v62 = vmul.f32 %v2852_v52, %v2804_v59  ;;  %v2515_v59 = vld [vmem:[#allocation8 + $0x230] ss:$12 sps:$4 sm:$0xff]  }
 0x152   :  { %v502_v33 = vrot.slane %v495_v4, %v2829_v26  ;;  %v2511_v4 = vld [vmem:[#allocation8 + $0x304] ss:$12 sps:$4 sm:$0xff]  }
 0x154   :  { %v510_v5 = vcombine.low %v502_v33, %v509_v18  ;;  %v2514_v18 = vld [vmem:[#allocation8 + $0x2f0] ss:$12 sps:$4 sm:$0xff]  }
 0x156   :  { %v2864_v35 = vsub.f32 %v94_v15, %v510_v5  ;;  %v2512_v15 = vld [vmem:[#allocation8 + $0xc8] ss:$12 sps:$4 sm:$0xff]   ;;  %v2516_v5 = vld [vmem:[#allocation8 + $0x3b0] ss:$12 sps:$4 sm:$0xff]  }
 0x158   :  { %v526_v7 = vrot.slane %v2864_v35, %v2840_v43  ;;  %v534_v8 = vrot.slane %v2864_v35, %v451_v45  ;;  %v522_v10 = vrot.slane %v2864_v35, %v2837_v41  ;;  %v530_v12 = vrot.slane %v2864_v35, %v2843_v44  ;;  %v2491_v45 = vld [vmem:[#allocation8 + $0x364] ss:$12 sps:$4 sm:$0xff]  }
 0x159   :  { %v538_v58 = vrot.slane %v2864_v35, %v455_v46  ;;  %v2513_v46 = vld [vmem:[#allocation8 + $0x8] ss:$12 sps:$4 sm:$0xff]   ;;  %v2517_v35 = vld [vmem:[#allocation8 + $0x2d8] ss:$12 sps:$4 sm:$0xff]  }
 0x15a   :  { %v545_v13 = vadd.f32 %v526_v7, %v514_v3  ;;  %v547_v14 = vadd.f32 %v534_v8, %v516_v6  ;;  %v544_v29 = vadd.f32 %v522_v10, %v513_v9  ;;  %v546_v19 = vadd.f32 %v530_v12, %v515_v11  ;;  %v2518_v3 = vld [vmem:[#allocation8 + $0x218] ss:$12 sps:$4 sm:$0xff]   ;;  %v2520_v7 = vld [vmem:[#allocation8 + $0x2c0] ss:$12 sps:$4 sm:$0xff]   ;;  %v2523_v10 = vld [vmem:[#allocation8 + $0x2a8] ss:$12 sps:$4 sm:$0xff]  }
 0x15b   :  { %v548_v2 = vadd.f32 %v538_v58, %v517_v62  ;;  %v2519_v6 = vld [vmem:[#allocation8 + $0x398] ss:$12 sps:$4 sm:$0xff]   ;;  %v2521_v8 = vld [vmem:[#allocation8 + $0x200] ss:$12 sps:$4 sm:$0xff]   ;;  %v2524_v11 = vld [vmem:[#allocation8 + $0x1e8] ss:$12 sps:$4 sm:$0xff]  }
 0x15c   :  { %v550_v30 = vmax.f32 %v545_v13, 0.0  ;;  %v552_v20 = vmax.f32 %v547_v14, 0.0  ;;  %v549_v21 = vmax.f32 %v544_v29, 0.0  ;;  %v551_v22 = vmax.f32 %v546_v19, 0.0  ;;  %v2522_v9 = vld [vmem:[#allocation8 + $0x380] ss:$12 sps:$4 sm:$0xff]  }
 0x15d   :  { %v553_v33 = vmax.f32 %v548_v2, 0.0  ;;  %v2525_v12 = vld [vmem:[#allocation8 + $0x368] ss:$12 sps:$4 sm:$0xff]   ;;  %v2526_v13 = vld [vmem:[#allocation8 + $0x290] ss:$12 sps:$4 sm:$0xff]   ;;  %v2560_v58 = vld [vmem:[#allocation10 + $0x80] sm:$0xff]  }
 0x15e   :  { %v555_v25 = vpack.c.bf16 %v550_v30, %v550_v30  ;;  %v2877_v27 = vpack.c.bf16 %v552_v20, %v552_v20  ;;  %v2879_v28 = vpack.c.bf16 %v549_v21, %v549_v21  ;;  %v2881_v32 = vpack.c.bf16 %v551_v22, %v551_v22  ;;  %v2527_v14 = vld [vmem:[#allocation8 + $0x1d0] ss:$12 sps:$4 sm:$0xff]   ;;  %v2529_v19 = vld [vmem:[#allocation8 + $0x278] ss:$12 sps:$4 sm:$0xff]   ;;  %v2532_v21 = vld [vmem:[#allocation8 + $0x260] ss:$12 sps:$4 sm:$0xff]  }
 0x15f   :  { %v558_v52 = vpack.c.bf16 %v553_v33, %v553_v33  ;;  %v2528_v29 = vld [vmem:[#allocation8 + $0x350] ss:$12 sps:$4 sm:$0xff]   ;;  %v2530_v30 = vld [vmem:[#allocation8 + $0x1b8] ss:$12 sps:$4 sm:$0xff]   ;;  %v2533_v22 = vld [vmem:[#allocation8 + $0x1a0] ss:$12 sps:$4 sm:$0xff]  }
 0x160   :  { %1391 = vmatprep.mubr.bf16.mxu1 %v555_v25  ;;  %1432 = vmatprep.mubr.bf16.mxu0 %v2877_v27  ;;  %v2531_v20 = vld [vmem:[#allocation8 + $0x338] ss:$12 sps:$4 sm:$0xff]  }
 0x161   :  { %1392 = vmatmul.mubr.bf16.vlgmr.msra.gmra.mxu1 %v2879_v28  ;;  %1433 = vmatmul.mubr.bf16.vlgmr.msra.gmra.mxu0 %v2881_v32 }
 0x162   :  { %1442 = vmatpush1.bf16.msra.mxu1 %v2474_v23  ;;  %2219 = vmatpush3.bf16.msra.mxu0 %v2478_v31  ;;  %v2536_v23 = vld [vmem:[#allocation8 + $0x188] ss:$12 sps:$4 sm:$0xff]   ;;  %v2538_v31 = vld [vmem:[#allocation10 + $0x78] sm:$0xff]  }
 0x163   :  { %1514 = vmatprep.mubr.bf16.mxu0 %v555_v25  ;;  %1443 = vmatprep.subr.bf16.mxu1 %v2481_v24  ;;  %v2534_v25 = vld [vmem:[#allocation8 + $0x320] ss:$12 sps:$4 sm:$0xff]   ;;  %v2539_v24 = vld [vmem:[#allocation10 + $0xb8] sm:$0xff]  }
 0x164   :  { %2220 = vmatprep.subr.bf16.mxu0 %v2482_v34  ;;  %1473 = vmatprep.mubr.bf16.mxu1 %v2719_v0  ;;  %v2498_v0 = vld [vmem:[#allocation8 + $0x50] ss:$12 sps:$4 sm:$0xff]  }
 0x165   :  { %v2540_v34 = vld [vmem:[#allocation10 + $0x38] sm:$0xff]  }
 0x166   :  { %1444 = vmatpush1.bf16.msra.mxu1 %v2479_v36  ;;  %2221 = vmatpush3.bf16.msra.mxu0 %v2483_v37  ;;  %v2541_v36 = vld [vmem:[#allocation10 + $0x70] sm:$0xff]  }
 0x167   :  { %1445 = vmatprep.subr.bf16.mxu1 %v2486_v38  ;;  %2222 = vmatprep.subr.bf16.mxu0 %v2487_v39  ;;  %v2542_v37 = vld [vmem:[#allocation10 + $0xb0] sm:$0xff]   ;;  %v2544_v39 = vld [vmem:[#allocation10 + $0x68] sm:$0xff]  }
 0x168   :  { %v2543_v38 = vld [vmem:[#allocation10 + $0x30] sm:$0xff]  }
 0x16a   :  { %1446 = vmatpush1.bf16.msra.mxu1 %v2484_v40  ;;  %2223 = vmatpush3.bf16.msra.mxu0 %v2488_v42  ;;  %v2545_v40 = vld [vmem:[#allocation10 + $0xa8] sm:$0xff]   ;;  %v2547_v42 = vld [vmem:[#allocation10 + $0x60] sm:$0xff]  }
 0x16b   :  { %1447 = vmatprep.subr.bf16.mxu1 %v2491_v45  ;;  %2224 = vmatprep.subr.bf16.mxu0 %v2492_v47  ;;  %v2548_v45 = vld [vmem:[#allocation10 + $0xa0] sm:$0xff]  }
 0x16c   :  { %v2549_v47 = vld [vmem:[#allocation10 + $0x20] sm:$0xff]  }
 0x16e   :  { %1448 = vmatpush1.bf16.msra.mxu1 %v2489_v48  ;;  %2225 = vmatpush3.bf16.msra.mxu0 %v2493_v49  ;;  %v2550_v48 = vld [vmem:[#allocation10 + $0x58] sm:$0xff]  }
 0x16f   :  { %1449 = vmatprep.subr.bf16.mxu1 %v2496_v50  ;;  %2226 = vmatprep.subr.bf16.mxu0 %v2497_v51  ;;  %v2551_v49 = vld [vmem:[#allocation10 + $0x98] sm:$0xff]   ;;  %v2553_v51 = vld [vmem:[#allocation10 + $0x50] sm:$0xff]  }
 0x170   :  { %v2552_v50 = vld [vmem:[#allocation10 + $0x18] sm:$0xff]  }
 0x172   :  { %1450 = vmatpush1.bf16.msra.mxu1 %v2494_v53  ;;  %2227 = vmatpush3.bf16.msra.mxu0 %v2498_v0  ;;  %v2554_v53 = vld [vmem:[#allocation10 + $0x90] sm:$0xff]  }
 0x173   :  { %1451 = vmatprep.subr.bf16.mxu1 %v2501_v54  ;;  %2228 = vmatprep.subr.bf16.mxu0 %v2502_v55  ;;  %v2555_v0 = vld [vmem:[#allocation10 + $0x10] sm:$0xff]   ;;  %v2556_v54 = vld [vmem:[#allocation10 + $0x48] sm:$0xff]  }
 0x174   :  { %v2557_v55 = vld [vmem:[#allocation10 + $0x88] sm:$0xff]  }
 0x176   :  { %1452 = vmatpush1.bf16.msra.mxu1 %v2499_v56  ;;  %2229 = vmatpush3.bf16.msra.mxu0 %v2503_v57  ;;  %v2558_v56 = vld [vmem:[#allocation10 + $0x8] sm:$0xff]   ;;  %v2559_v57 = vld [vmem:[#allocation10 + $0x40] sm:$0xff]  }
 0x177   :  { %1453 = vmatprep.subr.bf16.mxu1 %v2506_v60  ;;  %2230 = vmatprep.subr.bf16.mxu0 %v2507_v61  ;;  %v2561_v60 = vld [vmem:[#allocation10] sm:$0xff]  }
 0x17a   :  { %1454 = vmatpush1.bf16.msra.mxu1 %v2504_v63  ;;  %2231 = vmatpush3.bf16.msra.mxu0 %v2508_v1 }
 0x17b   :  { %1455 = vmatprep.subr.bf16.mxu1 %v2511_v4  ;;  %2232 = vmatprep.subr.bf16.mxu0 %v2512_v15 }
 0x17e   :  { %1456 = vmatpush1.bf16.msra.mxu1 %v2509_v17  ;;  %2233 = vmatpush3.bf16.msra.mxu0 %v2513_v46 }
 0x17f   :  { %2240 = vmatprep.subr.bf16.mxu1 %v2514_v18  ;;  %2310 = vmatprep.subr.bf16.mxu0 %v2720_v16 }
 0x181   :  { %1474 = vmatmul.mubr.bf16.vlgmr.msra.gmra.mxu1 %v558_v52  ;;  %1515 = vmatmul.mubr.bf16.vlgmr.msra.gmra.mxu0 %v2879_v28  ;;  %v2537_v28 = vld [vmem:[#allocation8 + $0x308] ss:$12 sps:$4 sm:$0xff]  }
 0x182   :  { %2241 = vmatpush3.bf16.msra.mxu1 %v2515_v59  ;;  %1554 = vmatprep.mubr.bf16.mxu1 %v2877_v27  ;;  %v2535_v27 = vld [vmem:[#allocation8 + $0x248] ss:$12 sps:$4 sm:$0xff]  }
 0x183   :  { %2311 = vmatpush3.bf16.msra.mxu0 %v2516_v5  ;;  %2242 = vmatprep.subr.bf16.mxu1 %v2517_v35 }
 0x184   :  { %2312 = vmatprep.subr.bf16.mxu0 %v2720_v16  ;;  %2326 = vmatprep.mubr.msk.bf16.mxu0 %vm2721_vm2, %v2720_v16 }
 0x186   :  { %2243 = vmatpush3.bf16.msra.mxu1 %v2518_v3 }
 0x187   :  { %2313 = vmatpush3.bf16.msra.mxu0 %v2519_v6  ;;  %2244 = vmatprep.subr.bf16.mxu1 %v2520_v7 }
 0x188   :  { %2314 = vmatprep.subr.bf16.mxu0 %v2720_v16 }
 0x18a   :  { %2245 = vmatpush3.bf16.msra.mxu1 %v2521_v8 }
 0x18b   :  { %2315 = vmatpush3.bf16.msra.mxu0 %v2522_v9  ;;  %2246 = vmatprep.subr.bf16.mxu1 %v2523_v10 }
 0x18c   :  { %2316 = vmatprep.subr.bf16.mxu0 %v2720_v16 }
 0x18e   :  { %2247 = vmatpush3.bf16.msra.mxu1 %v2524_v11 }
 0x18f   :  { %2317 = vmatpush3.bf16.msra.mxu0 %v2525_v12  ;;  %2248 = vmatprep.subr.bf16.mxu1 %v2526_v13 }
 0x190   :  { %2318 = vmatprep.subr.bf16.mxu0 %v2720_v16 }
 0x192   :  { %2249 = vmatpush3.bf16.msra.mxu1 %v2527_v14 }
 0x193   :  { %2319 = vmatpush3.bf16.msra.mxu0 %v2528_v29  ;;  %2250 = vmatprep.subr.bf16.mxu1 %v2529_v19 }
 0x194   :  { %2320 = vmatprep.subr.bf16.mxu0 %v2720_v16 }
 0x196   :  { %2251 = vmatpush3.bf16.msra.mxu1 %v2530_v30 }
 0x197   :  { %2321 = vmatpush3.bf16.msra.mxu0 %v2531_v20  ;;  %2252 = vmatprep.subr.bf16.mxu1 %v2532_v21 }
 0x198   :  { %2322 = vmatprep.subr.bf16.mxu0 %v2720_v16 }
 0x19a   :  { %2253 = vmatpush3.bf16.msra.mxu1 %v2533_v22 }
 0x19b   :  { %2323 = vmatpush3.bf16.msra.mxu0 %v2534_v25  ;;  %2254 = vmatprep.subr.bf16.mxu1 %v2535_v27 }
 0x19c   :  { %2324 = vmatprep.subr.bf16.mxu0 %v2720_v16 }
 0x19e   :  { %2255 = vmatpush3.bf16.msra.mxu1 %v2536_v23 }
 0x19f   :  { %2325 = vmatpush3.bf16.msra.mxu0 %v2537_v28  ;;  %2271 = vmatprep.subr.bf16.mxu1 %v2538_v31 }
 0x1a0   :  { %2330 = vmatprep.subr.bf16.mxu0 %v2720_v16 }
 0x1a1   :  { %1555 = vmatmul.mubr.bf16.vlgmr.msra.gmra.mxu1 %v2881_v32  ;;  %v2546_v32 = vld [vmem:[#allocation10 + $0x28] sm:$0xff]  }
 0x1a2   :  { %2327 = vmatmul.mubr.bf16.vlgmr.msra.gmra.mxu0 %v558_v52  ;;  %2272 = vmatpush3.bf16.msra.mxu1 %v2540_v34 }
 0x1a3   :  { %2346 = vmatprep.mubr.msk.bf16.mxu0 %vm2721_vm2, %v2720_v16  ;;  %2331 = vmatpush3.bf16.msra.mxu0 %v2539_v24 }
 0x1a4   :  { %2332 = vmatprep.subr.bf16.mxu0 %v2720_v16  ;;  %2273 = vmatprep.subr.bf16.mxu1 %v2541_v36 }
 0x1a6   :  { %2274 = vmatpush3.bf16.msra.mxu1 %v2543_v38 }
 0x1a7   :  { %2333 = vmatpush3.bf16.msra.mxu0 %v2542_v37  ;;  %2275 = vmatprep.subr.bf16.mxu1 %v2544_v39 }
 0x1a8   :  { %2334 = vmatprep.subr.bf16.mxu0 %v2720_v16 }
 0x1aa   :  { %2276 = vmatpush3.bf16.msra.mxu1 %v2546_v32 }
 0x1ab   :  { %2335 = vmatpush3.bf16.msra.mxu0 %v2545_v40  ;;  %2277 = vmatprep.subr.bf16.mxu1 %v2547_v42 }
 0x1ac   :  { %2336 = vmatprep.subr.bf16.mxu0 %v2720_v16 }
 0x1ae   :  { %2278 = vmatpush3.bf16.msra.mxu1 %v2549_v47 }
 0x1af   :  { %2337 = vmatpush3.bf16.msra.mxu0 %v2548_v45  ;;  %2279 = vmatprep.subr.bf16.mxu1 %v2550_v48 }
 0x1b0   :  { %2338 = vmatprep.subr.bf16.mxu0 %v2720_v16 }
 0x1b2   :  { %2280 = vmatpush3.bf16.msra.mxu1 %v2552_v50 }
 0x1b3   :  { %2339 = vmatpush3.bf16.msra.mxu0 %v2551_v49  ;;  %2281 = vmatprep.subr.bf16.mxu1 %v2553_v51 }
 0x1b4   :  { %2340 = vmatprep.subr.bf16.mxu0 %v2720_v16 }
 0x1b6   :  { %2282 = vmatpush3.bf16.msra.mxu1 %v2555_v0 }
 0x1b7   :  { %2341 = vmatpush3.bf16.msra.mxu0 %v2554_v53  ;;  %2283 = vmatprep.subr.bf16.mxu1 %v2556_v54 }
 0x1b8   :  { %2342 = vmatprep.subr.bf16.mxu0 %v2720_v16 }
 0x1ba   :  { %2284 = vmatpush3.bf16.msra.mxu1 %v2558_v56 }
 0x1bb   :  { %2343 = vmatpush3.bf16.msra.mxu0 %v2557_v55  ;;  %2285 = vmatprep.subr.bf16.mxu1 %v2559_v57 }
 0x1bc   :  { %2344 = vmatprep.subr.bf16.mxu0 %v2720_v16 }
 0x1be   :  { %2286 = vmatpush3.bf16.msra.mxu1 %v2561_v60 }
 0x1bf   :  { %2345 = vmatpush3.bf16.msra.mxu0 %v2560_v58 }
 0x221   :  { %v1393_v61 = vpop.f32.mrf.mxu1  ;;  %v1434_v62 = vpop.f32.mrf.mxu0 }
 0x222   :  { %v1435_v63 = vadd.f32 %v1434_v62, %v1393_v61 }
 0x223   :  { %v1395_v1 = vpop.f32.mrf.mxu1  ;;  %v1436_v2 = vpop.f32.mrf.mxu0 }
 0x224   :  { %v1437_v4 = vadd.f32 %v1436_v2, %v1395_v1 }
 0x225   :  { %v1397_v15 = vpop.f32.mrf.mxu1  ;;  %v1438_v17 = vpop.f32.mrf.mxu0 }
 0x227   :  { %v1398_v46 = vpop.f32.mrf.mxu1  ;;  %v1439_v33 = vpop.f32.mrf.mxu0 }
 0x241   :  { %v1475_v18 = vpop.f32.mrf.mxu1  ;;  %v2234_v59 = vpop.f32.mrf.mxu0 }
 0x242   :  { %v2915_v52 = vadd.f32 %v1475_v18, %v1435_v63 }
 0x243   :  { %v1477_v5 = vpop.f32.mrf.mxu1  ;;  %v2235_v16 = vpop.f32.mrf.mxu0 }
 0x244   :  { %v1602_v35 = vrot.slane %v2915_v52, 4  ;;  %v1623_v3 = vmul.f32 %v2915_v52, %v2915_v52  ;;  %v2920_v6 = vadd.f32 %v1477_v5, %v1437_v4  ;;  %v2236_v62 = vadd.f32 %v2235_v16, %v2234_v59 }
 0x245   :  { %v1479_v7 = vpop.f32.mrf.mxu1  ;;  %v2237_v8 = vpop.f32.mrf.mxu0 }
 0x246   :  { %v1603_v9 = vadd.f32 %v1602_v35, %v2915_v52  ;;  %v1626_v10 = vrot.slane %v1623_v3, 4  ;;  %v1608_v11 = vrot.slane %v2920_v6, 4  ;;  %v1624_v12 = vmul.f32 %v2920_v6, %v2920_v6 }
 0x247   :  { %v1480_v13 = vpop.f32.mrf.mxu1  ;;  %v2238_v14 = vpop.f32.mrf.mxu0 }
 0x248   :  { %v1604_v29 = vrot.slane %v1603_v9, 2  ;;  %v1627_v19 = vadd.f32 %v1626_v10, %v1623_v3  ;;  %v1609_v30 = vadd.f32 %v1608_v11, %v2920_v6  ;;  %v1632_v20 = vrot.slane %v1624_v12, 4 }
 0x24a   :  { %v1605_v21 = vadd.f32 %v1604_v29, %v1603_v9  ;;  %v1628_v22 = vrot.slane %v1627_v19, 2  ;;  %v1610_v25 = vrot.slane %v1609_v30, 2  ;;  %v1633_v27 = vadd.f32 %v1632_v20, %v1624_v12 }
 0x24c   :  { %v1606_v23 = vrot.slane %v1605_v21, 1  ;;  %v1629_v28 = vadd.f32 %v1628_v22, %v1627_v19  ;;  %v1611_v31 = vadd.f32 %v1610_v25, %v1609_v30  ;;  %v1634_v24 = vrot.slane %v1633_v27, 2 }
 0x24e   :  { %v1607_v34 = vadd.f32 %v1606_v23, %v1605_v21  ;;  %v1630_v36 = vrot.slane %v1629_v28, 1  ;;  %v1612_v37 = vrot.slane %v1611_v31, 1  ;;  %v1635_v38 = vadd.f32 %v1634_v24, %v1633_v27 }
 0x250   :  { %v2927_v39 = vmul.f32 0.125, %v1607_v34  ;;  %v1631_v40 = vadd.f32 %v1630_v36, %v1629_v28  ;;  %v1613_v32 = vadd.f32 %v1612_v37, %v1611_v31  ;;  %v1636_v42 = vrot.slane %v1635_v38, 1  ;;  %v96_v34 = vld [vmem:[#allocation7 + $0x2] ss:$8 sm:$0x7] }
 0x252   :  { %v1644_v45 = vmul.f32 0.125, %v1631_v40  ;;  %v1647_v47 = vmul.f32 %v2927_v39, %v2927_v39  ;;  %v1637_v48 = vadd.f32 %v1636_v42, %v1635_v38  ;;  %v1621_v49 = vmul.f32 0.125, %v1613_v32 }
 0x254   :  { %v1650_v50 = vsub.f32 %v1644_v45, %v1647_v47  ;;  %v1645_v51 = vmul.f32 0.125, %v1637_v48  ;;  %v1648_v53 = vmul.f32 %v1621_v49, %v1621_v49 }
 0x256   :  { %v1653_v0 = vmax.f32 %v1650_v50, 0.0  ;;  %v1651_v54 = vsub.f32 %v1645_v51, %v1648_v53 }
 0x258   :  { %v1656_v55 = vadd.f32 1e-05, %v1653_v0  ;;  %v1654_v56 = vmax.f32 %v1651_v54, 0.0 }
 0x25a   :  { %v1657_v57 = vadd.f32 1e-05, %v1654_v56  ;;  %2572 = vrsqrt.f32 %v1656_v55  ;;  %v98_v55 = vld [vmem:[#allocation7 + $0x3] ss:$8 sm:$0x7] }
 0x25c   :  { %2574 = vrsqrt.f32 %v1657_v57 }
 0x261   :  { %v2256_v58 = vpop.f32.mrf.mxu1 }
 0x262   :  { %v1596_v60 = vpop.f32.mrf.mxu0 }
 0x263   :  { %v2257_v61 = vpop.f32.mrf.mxu1 }
 0x264   :  { %v2258_v63 = vadd.f32 %v2257_v61, %v2256_v58  ;;  %v2328_v1 = vpop.f32.mrf.mxu0 }
 0x265   :  { %v2259_v2 = vpop.f32.mrf.mxu1 }
 0x266   :  { %v1557_v4 = vadd.f32 %v2258_v63, %v2236_v62  ;;  %v1599_v15 = vpop.f32.mrf.mxu0 }
 0x267   :  { %v2260_v17 = vpop.f32.mrf.mxu1  ;;  %v2573_v46 = vpop.eup %2572 }
 0x268   :  { %v1597_v33 = vadd.f32 %v1596_v60, %v1557_v4  ;;  %v2329_v18 = vpop.f32.mrf.mxu0 }
 0x269   :  { %v2575_v5 = vpop.eup %2574 }
 0x26a   :  { %v1614_v35 = vrot.slane %v1597_v33, 4  ;;  %v1625_v3 = vmul.f32 %v1597_v33, %v1597_v33  ;;  %v1665_v7 = vcombine.low %v2573_v46, %v2575_v5 }
 0x26c   :  { %v1615_v8 = vadd.f32 %v1614_v35, %v1597_v33  ;;  %v1638_v9 = vrot.slane %v1625_v3, 4  ;;  %v1672_v28 = vrot.slane %v1665_v7, %v2829_v26 }
 0x26e   :  { %v1616_v10 = vrot.slane %v1615_v8, 2  ;;  %v1639_v11 = vadd.f32 %v1638_v9, %v1625_v3 }
 0x270   :  { %v1617_v12 = vadd.f32 %v1616_v10, %v1615_v8  ;;  %v1640_v13 = vrot.slane %v1639_v11, 2 }
 0x272   :  { %v1618_v59 = vrot.slane %v1617_v12, 1  ;;  %v1641_v16 = vadd.f32 %v1640_v13, %v1639_v11 }
 0x274   :  { %v1619_v14 = vadd.f32 %v1618_v59, %v1617_v12  ;;  %v1642_v29 = vrot.slane %v1641_v16, 1 }
 0x276   :  { %v1622_v19 = vmul.f32 0.125, %v1619_v14  ;;  %v1643_v30 = vadd.f32 %v1642_v29, %v1641_v16 }
 0x278   :  { %v1646_v20 = vmul.f32 0.125, %v1643_v30  ;;  %v1649_v21 = vmul.f32 %v1622_v19, %v1622_v19 }
 0x27a   :  { %v1652_v22 = vsub.f32 %v1646_v20, %v1649_v21 }
 0x27c   :  { %v1655_v25 = vmax.f32 %v1652_v22, 0.0 }
 0x27e   :  { %v1658_v27 = vadd.f32 1e-05, %v1655_v25 }
 0x280   :  { %2576 = vrsqrt.f32 %v1658_v27 }
 0x28d   :  { %v2577_v23 = vpop.eup %2576 }
 0x28e   :  { %v1679_v31 = vrot.slane %v2577_v23, %v2829_v26 }
 0x290   :  { %v1680_v24 = vcombine.low %v1672_v28, %v1679_v31 }
 0x292   :  { %v1687_v36 = vrot.slane %v1680_v24, %v2829_v26 }
 0x294   :  { %v1689_v37 = vmul.f32 %v1687_v36, %v96_v34 }
 0x296   :  { %v1694_v38 = vrot.slane %v1689_v37, %v2837_v41  ;;  %v1698_v40 = vrot.slane %v1689_v37, %v2840_v43  ;;  %v1702_v32 = vrot.slane %v1689_v37, %v2843_v44 }
 0x298   :  { %v1706_v42 = vmul.f32 %v1694_v38, %v2927_v39  ;;  %v1707_v45 = vmul.f32 %v1698_v40, %v1621_v49  ;;  %v1708_v47 = vmul.f32 %v1702_v32, %v1622_v19  ;;  %v1738_v48 = vmul.f32 %v1698_v40, %v2920_v6 }
 0x299   :  { %v1737_v50 = vmul.f32 %v1694_v38, %v2915_v52  ;;  %v1739_v60 = vmul.f32 %v1702_v32, %v1597_v33 }
 0x29a   :  { %v1712_v51 = vcombine.low %v1706_v42, %v1707_v45  ;;  %v1726_v0 = vrot.slane %v1708_v47, %v2829_v26 }
 0x29c   :  { %v1719_v53 = vrot.slane %v1712_v51, %v2829_v26 }
 0x29e   :  { %v1727_v54 = vcombine.low %v1719_v53, %v1726_v0 }
 0x2a0   :  { %v1734_v56 = vrot.slane %v1727_v54, %v2829_v26 }
 0x2a2   :  { %v1736_v57 = vsub.f32 %v98_v55, %v1734_v56 }
 0x2a4   :  { %v1748_v58 = vrot.slane %v1736_v57, %v2840_v43  ;;  %v1752_v39 = vrot.slane %v1736_v57, %v2843_v44  ;;  %v1744_v49 = vrot.slane %v1736_v57, %v2837_v41 }
 0x2a6   :  { %v1757_v6 = vadd.f32 %v1748_v58, %v1738_v48  ;;  %v1758_v61 = vadd.f32 %v1752_v39, %v1739_v60  ;;  %v1756_v52 = vadd.f32 %v1744_v49, %v1737_v50 }
 0x2a8   :  { %v1760_v62 = vmax.f32 %v1757_v6, 0.0  ;;  %v1761_v63 = vmax.f32 %v1758_v61, 0.0  ;;  %v1759_v1 = vmax.f32 %v1756_v52, 0.0 }
 0x2aa   :  { %v1763_v2 = vpack.c.bf16 %v1760_v62, %v1760_v62  ;;  %v1764_v4 = vpack.c.bf16 %v1761_v63, %v1761_v63  ;;  %v1762_v15 = vpack.c.bf16 %v1759_v1, %v1759_v1 }
 0x2ac   :  { %1989 = vmatprep.mubr.bf16.mxu1 %v1763_v2  ;;  %2347 = vmatmul.mubr.bf16.vlgmr.msra.gmra.mxu0 %v1764_v4 }
 0x2ad   :  { %1990 = vmatmul.mubr.bf16.vlgmr.msra.gmra.mxu1 %v1762_v15 }
 0x36c   :  { %v2031_v26 = vpop.f32.mrf.mxu0 }
 0x36d   :  { %v2287_v17 = vpop.f32.mrf.mxu1 }
 0x36e   :  { %v2348_v43 = vpop.f32.mrf.mxu0 }
 0x36f   :  { %v2288_v46 = vpop.f32.mrf.mxu1 }
 0x370   :  { %v2289_v33 = vadd.f32 %v2288_v46, %v2287_v17  ;;  %v2034_v44 = vpop.f32.mrf.mxu0 }
 0x371   :  { %v2290_v18 = vpop.f32.mrf.mxu1 }
 0x372   :  { %v2032_v41 = vadd.f32 %v2289_v33, %v2031_v26  ;;  %v2349_v5 = vpop.f32.mrf.mxu0 }
 0x373   :  { %v2291_v35 = vpop.f32.mrf.mxu1 }
 0x374   :  { %2578 = vtanh.f32 %v2032_v41 }
 0x381   :  { %v2579_v3 = vpop.eup %2578 }
 0x382   :  { %2038 = vst [vmem:[#allocation11] sm:$0xff] %v2579_v3 }
 0x383   :  { %2691 = shalt.err (!%p2688_p1)
}
 0x384   :  { %2048 = dma.vmem_to_hbm [thread:$0]  %s2046_s4, 128, %s2954_s5, [#allocation4]  }
 0x385   :  { %2706 = dma.done.wait [#allocation4], 128  }
 0x386   :  { %2707 = vsyncadd [#allocation4], 4294967168 }
 0x387   :  { %2052 = vsyncpa [#allocation3], 1 }
 0x388   :  { %2053 = vsyncpa [#allocation6], 1 }
 0x389   :  { %2054 = vsyncpa [#allocation9], 1 }
 0x38a   :  { %2055 = vsyncpa [#allocation4], 1 }

</bundles_post_ra>
